<compile_context>
chip_gen: v7x
topology: tpu7x:2x2x1
jax: 0.10.0
libtpu: 0.0.40
codegen_flags: <defaults>
</compile_context>

<pallas_src>
import math
import jax
import jax.numpy as jnp
from jax.experimental import pallas as pl
from jax.experimental.pallas import tpu as pltpu


# ----------------------------- Pallas kernels -----------------------------

def _ln_kernel(x_ref, g_ref, b_ref, o_ref):
    # Residual-free LayerNorm (embedding LN).  All math in f32.
    x = x_ref[...].astype(jnp.float32)
    mu = jnp.mean(x, axis=-1, keepdims=True)
    var = jnp.mean((x - mu) ** 2, axis=-1, keepdims=True)
    y = (x - mu) * jax.lax.rsqrt(var + 1e-12)   # DistilBERT LayerNorm eps = 1e-12
    o_ref[...] = (y * g_ref[...] + b_ref[...]).astype(o_ref.dtype)


def _linear_kernel(x_ref, w_ref, b_ref, o_ref):
    # y = x @ w + b  -- bf16 MXU operands, f32 accumulation.
    y = jnp.dot(x_ref[...].astype(jnp.bfloat16), w_ref[...],
                preferred_element_type=jnp.float32) + b_ref[...]
    o_ref[...] = y.astype(o_ref.dtype)


def _linear_gelu_kernel(x_ref, w_ref, b_ref, o_ref):
    y = jnp.dot(x_ref[...].astype(jnp.bfloat16), w_ref[...],
                preferred_element_type=jnp.float32) + b_ref[...]
    # TODO(synk): DistilBERT uses exact (erf) GELU; tanh approximation kept for safe TPU lowering.
    o_ref[...] = jax.nn.gelu(y, approximate=True).astype(o_ref.dtype)


def _linear_add_ln_kernel(x_ref, w_ref, b_ref, res_ref, g_ref, beta_ref, o_ref):
    # Fused: (x @ w + b) + residual, then LayerNorm.  MXU in bf16, LN in f32.
    y = jnp.dot(x_ref[...].astype(jnp.bfloat16), w_ref[...],
                preferred_element_type=jnp.float32) + b_ref[...]
    s = y + res_ref[...].astype(jnp.float32)
    mu = jnp.mean(s, axis=-1, keepdims=True)
    var = jnp.mean((s - mu) ** 2, axis=-1, keepdims=True)
    n = (s - mu) * jax.lax.rsqrt(var + 1e-12)
    o_ref[...] = (n * g_ref[...] + beta_ref[...]).astype(o_ref.dtype)


def _make_attention_kernel(n_heads, hidden):
    hd = hidden // n_heads
    scale = 1.0 / math.sqrt(hd)

    def kernel(qkv_ref, bias_ref, o_ref):
        # qkv block: (1, S, 3H) bf16 ; bias block: (1, 1, S) f32 additive key-mask.
        qkv = qkv_ref[0]            # (S, 3H)
        bias = bias_ref[0]          # (1, S)
        # Heads are split by static lane slices inside VMEM (no HBM transposes).
        for h in range(n_heads):
            q = qkv[:, h * hd:(h + 1) * hd]
            k = qkv[:, hidden + h * hd:hidden + (h + 1) * hd]
            v = qkv[:, 2 * hidden + h * hd:2 * hidden + (h + 1) * hd]
            # scores = (q @ k^T) / sqrt(hd)   (bf16 operands, f32 accumulate)
            scores = jax.lax.dot_general(
                q, k, (((1,), (1,)), ((), ())),
                preferred_element_type=jnp.float32) * scale          # (S, S)
            scores = scores + bias                                    # mask over key positions
            m = jnp.max(scores, axis=-1, keepdims=True)
            e = jnp.exp(scores - m)
            denom = jnp.sum(e, axis=-1, keepdims=True)
            p = e * pl.reciprocal(denom, approx=True)
            ctx = jnp.dot(p.astype(jnp.bfloat16), v,
                          preferred_element_type=jnp.float32)         # (S, hd)
            # Write this head's slice of the lane-dense (S, H) output block.
            o_ref[0, :, h * hd:(h + 1) * hd] = ctx.astype(o_ref.dtype)

    return kernel


# ----------------------------- wrappers -----------------------------------
# TODO(synk): at real DistilBERT sizes (H=768, FFN=3072, thousands of tokens) these
# whole-block grid=(1,) calls should become tiled (M//tm, N//tn, K//tk) grids with an
# f32 VMEM accumulator, dimension_semantics=("parallel","parallel","arbitrary") and an
# explicit vmem_limit_bytes re-derived for v7x's 64 MiB VMEM.  At these demo shapes a
# single full block is optimal.

def pallas_linear(x, w, b, *, activation=None, out_dtype=jnp.float32):
    M, K = x.shape
    N = w.shape[1]
    kern = _linear_gelu_kernel if activation == 'gelu' else _linear_kernel
    return pl.pallas_call(
        kern,
        out_shape=jax.ShapeDtypeStruct((M, N), out_dtype),
        grid=(1,),
        in_specs=[pl.BlockSpec((M, K), lambda i: (0, 0)),
                  pl.BlockSpec((K, N), lambda i: (0, 0)),
                  pl.BlockSpec((1, N), lambda i: (0, 0))],
        out_specs=pl.BlockSpec((M, N), lambda i: (0, 0)),
    )(x, w, b.reshape(1, N))


def pallas_linear_add_ln(x, w, b, res, gamma, beta):
    M, K = x.shape
    N = w.shape[1]
    return pl.pallas_call(
        _linear_add_ln_kernel,
        out_shape=jax.ShapeDtypeStruct((M, N), jnp.float32),
        grid=(1,),
        in_specs=[pl.BlockSpec((M, K), lambda i: (0, 0)),
                  pl.BlockSpec((K, N), lambda i: (0, 0)),
                  pl.BlockSpec((1, N), lambda i: (0, 0)),
                  pl.BlockSpec((M, N), lambda i: (0, 0)),
                  pl.BlockSpec((1, N), lambda i: (0, 0)),
                  pl.BlockSpec((1, N), lambda i: (0, 0))],
        out_specs=pl.BlockSpec((M, N), lambda i: (0, 0)),
    )(x, w, b.reshape(1, N), res, gamma.reshape(1, N), beta.reshape(1, N))


def pallas_layernorm(x, gamma, beta):
    M, H = x.shape
    return pl.pallas_call(
        _ln_kernel,
        out_shape=jax.ShapeDtypeStruct((M, H), jnp.float32),
        grid=(1,),
        in_specs=[pl.BlockSpec((M, H), lambda i: (0, 0)),
                  pl.BlockSpec((1, H), lambda i: (0, 0)),
                  pl.BlockSpec((1, H), lambda i: (0, 0))],
        out_specs=pl.BlockSpec((M, H), lambda i: (0, 0)),
    )(x, gamma.reshape(1, H), beta.reshape(1, H))


def pallas_attention(qkv, attention_mask, n_heads):
    B, S, H3 = qkv.shape
    H = H3 // 3
    # Precompute the additive mask bias once (0 for keep, large-negative for pad).
    bias = jnp.where(attention_mask.reshape(B, 1, S) == 0, -1e30, 0.0).astype(jnp.float32)
    return pl.pallas_call(
        _make_attention_kernel(n_heads, H),
        out_shape=jax.ShapeDtypeStruct((B, S, H), jnp.bfloat16),
        grid=(B,),
        in_specs=[pl.BlockSpec((1, S, H3), lambda b: (b, 0, 0)),
                  pl.BlockSpec((1, 1, S), lambda b: (b, 0, 0))],
        out_specs=pl.BlockSpec((1, S, H), lambda b: (b, 0, 0)),
        compiler_params=pltpu.CompilerParams(dimension_semantics=("parallel",)),
    )(qkv, bias)


# ----------------------------- model --------------------------------------

CFG = dict(vocab_size=100, max_pos=32, hidden=64, n_heads=4,
           ffn=128, n_layers=2, num_classes=3)

LANE = 128  # classifier output padded to a full lane width for dense stores


def init_params(key, cfg):
    H, F, C = cfg['hidden'], cfg['ffn'], cfg['num_classes']

    def dense(k, din, dout):
        kw, _ = jax.random.split(k)
        return (jax.random.normal(kw, (din, dout), jnp.float32) * 0.02,
                jnp.zeros((dout,), jnp.float32))

    keys = jax.random.split(key, 4 + cfg['n_layers'])
    params = {
        'word_emb': jax.random.normal(keys[0], (cfg['vocab_size'], H), jnp.float32) * 0.02,
        'pos_emb': jax.random.normal(keys[1], (cfg['max_pos'], H), jnp.float32) * 0.02,
        'emb_ln_g': jnp.ones((H,), jnp.float32),
        'emb_ln_b': jnp.zeros((H,), jnp.float32),
    }
    cls_w, cls_b = dense(keys[2], H, C)
    # Pad classifier weights to 128 output lanes; logits are sliced back to C.
    params['cls_w'] = jnp.zeros((H, LANE), jnp.bfloat16).at[:, :C].set(cls_w.astype(jnp.bfloat16))
    params['cls_b'] = jnp.zeros((LANE,), jnp.float32).at[:C].set(cls_b)

    layers = []
    for li in range(cfg['n_layers']):
        lk = jax.random.split(keys[4 + li], 6)
        layer = {}
        q_w, q_b = dense(lk[0], H, H)
        k_w, k_b = dense(lk[1], H, H)
        v_w, v_b = dense(lk[2], H, H)
        # Fused QKV projection: one [H, 3H] bf16 weight.
        layer['qkv_w'] = jnp.concatenate([q_w, k_w, v_w], axis=1).astype(jnp.bfloat16)
        layer['qkv_b'] = jnp.concatenate([q_b, k_b, v_b], axis=0)
        o_w, layer['o_b'] = dense(lk[3], H, H)
        ff1_w, layer['ff1_b'] = dense(lk[4], H, F)
        ff2_w, layer['ff2_b'] = dense(lk[5], F, H)
        layer['o_w'] = o_w.astype(jnp.bfloat16)
        layer['ff1_w'] = ff1_w.astype(jnp.bfloat16)
        layer['ff2_w'] = ff2_w.astype(jnp.bfloat16)
        layer['sa_ln_g'] = jnp.ones((H,), jnp.float32)
        layer['sa_ln_b'] = jnp.zeros((H,), jnp.float32)
        layer['out_ln_g'] = jnp.ones((H,), jnp.float32)
        layer['out_ln_b'] = jnp.zeros((H,), jnp.float32)
        layers.append(layer)
    params['layers'] = layers
    return params


def distilbert_classifier(params, input_ids, attention_mask, cfg):
    B, S = input_ids.shape
    H = cfg['hidden']
    nH = cfg['n_heads']
    C = cfg['num_classes']

    # Embedding gather stays in plain JAX (no clean Pallas equivalent at this size).
    we = jnp.take(params['word_emb'], input_ids, axis=0)          # (B, S, H)
    pe = params['pos_emb'][:S]                                    # (S, H)
    x = (we + pe[None]).astype(jnp.float32).reshape(B * S, H)
    x = pallas_layernorm(x, params['emb_ln_g'], params['emb_ln_b'])
    # embedding dropout -> identity at inference

    for layer in params['layers']:
        # 1) fused QKV projection (bf16 MXU)
        qkv = pallas_linear(x, layer['qkv_w'], layer['qkv_b'], out_dtype=jnp.bfloat16)
        # 2) multi-head attention (heads split by lane slices inside the kernel)
        ctx = pallas_attention(qkv.reshape(B, S, 3 * H), attention_mask, nH)   # (B, S, H)
        ctx = ctx.reshape(B * S, H)
        # 3) out-projection + residual + LayerNorm fused
        sa = pallas_linear_add_ln(ctx, layer['o_w'], layer['o_b'], x,
                                  layer['sa_ln_g'], layer['sa_ln_b'])
        # 4) FFN lin1 + GELU fused
        h1 = pallas_linear(sa, layer['ff1_w'], layer['ff1_b'],
                           activation='gelu', out_dtype=jnp.bfloat16)
        # 5) FFN lin2 + residual + LayerNorm fused
        x = pallas_linear_add_ln(h1, layer['ff2_w'], layer['ff2_b'], sa,
                                 layer['out_ln_g'], layer['out_ln_b'])

    h = x.reshape(B, S, H)
    cls = h[:, 0, :]                         # pooled_output = last_hidden_state[:, 0, :]
    # nn.Dropout(0.3) -> identity at inference
    logits = pallas_linear(cls, params['cls_w'], params['cls_b'])[:, :C]
    return logits


if __name__ == "__main__":
    cfg = CFG
    key = jax.random.PRNGKey(0)
    kp, kids = jax.random.split(key)
    params = init_params(kp, cfg)

    B, S = 2, 8
    input_ids = jax.random.randint(kids, (B, S), 0, cfg['vocab_size'], dtype=jnp.int32)
    attention_mask = jnp.array([[1, 1, 1, 1, 1, 1, 1, 1],
                                [1, 1, 1, 1, 1, 0, 0, 0]], dtype=jnp.int32)

    logits = distilbert_classifier(params, input_ids, attention_mask, cfg)
    jax.block_until_ready(logits)
    assert logits.shape == (B, cfg['num_classes'])
    assert bool(jnp.all(jnp.isfinite(logits)))
    print("KERNEL_OK")
</pallas_src>

<mosaic_0001>
module attributes {stable_mosaic.version = 11 : i64} {
  func.func @_ln_kernel(%arg0: i32, %arg1: memref<16x64xf32, #tpu.memory_space<vmem>>, %arg2: memref<1x64xf32, #tpu.memory_space<vmem>>, %arg3: memref<1x64xf32, #tpu.memory_space<vmem>>, %arg4: memref<16x64xf32, #tpu.memory_space<vmem>>) attributes {dimension_semantics = [#tpu.dimension_semantics<arbitrary>], iteration_bounds = array<i64: 1>, scalar_prefetch = 0 : i64, scratch_operands = 0 : i64, tpu.core_type = #tpu.core_type<tc>, window_params = [{pipeline_mode = #tpu.pipeline_mode<synchronous>, transform_indices = @transform_0, window_bounds = array<i64: 16, 64>}, {pipeline_mode = #tpu.pipeline_mode<synchronous>, transform_indices = @transform_1, window_bounds = array<i64: 1, 64>}, {pipeline_mode = #tpu.pipeline_mode<synchronous>, transform_indices = @transform_2, window_bounds = array<i64: 1, 64>}, {pipeline_mode = #tpu.pipeline_mode<synchronous>, transform_indices = @transform_3, window_bounds = array<i64: 16, 64>}]} {
    %c0 = arith.constant 0 : index
    %c0_0 = arith.constant 0 : index
    %0 = vector.load %arg1[%c0, %c0_0] : memref<16x64xf32, #tpu.memory_space<vmem>>, vector<16x64xf32>
    %cst = arith.constant dense<0.000000e+00> : vector<16xf32>
    %1 = vector.multi_reduction <add>, %0, %cst [1] : vector<16x64xf32> to vector<16xf32>
    %2 = vector.shape_cast %1 : vector<16xf32> to vector<16x1xf32>
    %cst_1 = arith.constant 6.400000e+01 : f32
    %3 = vector.broadcast %cst_1 : f32 to vector<16x1xf32>
    %4 = arith.divf %2, %3 : vector<16x1xf32>
    %5 = vector.broadcast %4 : vector<16x1xf32> to vector<16x64xf32>
    %6 = arith.subf %0, %5 : vector<16x64xf32>
    %7 = arith.mulf %6, %6 : vector<16x64xf32>
    %cst_2 = arith.constant dense<0.000000e+00> : vector<16xf32>
    %8 = vector.multi_reduction <add>, %7, %cst_2 [1] : vector<16x64xf32> to vector<16xf32>
    %9 = vector.shape_cast %8 : vector<16xf32> to vector<16x1xf32>
    %cst_3 = arith.constant 6.400000e+01 : f32
    %10 = vector.broadcast %cst_3 : f32 to vector<16x1xf32>
    %11 = arith.divf %9, %10 : vector<16x1xf32>
    %12 = vector.broadcast %4 : vector<16x1xf32> to vector<16x64xf32>
    %13 = arith.subf %0, %12 : vector<16x64xf32>
    %cst_4 = arith.constant 9.99999996E-13 : f32
    %14 = vector.broadcast %cst_4 : f32 to vector<16x1xf32>
    %15 = arith.addf %11, %14 : vector<16x1xf32>
    %16 = math.rsqrt %15 : vector<16x1xf32>
    %17 = vector.broadcast %16 : vector<16x1xf32> to vector<16x64xf32>
    %18 = arith.mulf %13, %17 : vector<16x64xf32>
    %c0_5 = arith.constant 0 : index
    %c0_6 = arith.constant 0 : index
    %19 = vector.load %arg2[%c0_5, %c0_6] : memref<1x64xf32, #tpu.memory_space<vmem>>, vector<1x64xf32>
    %20 = vector.broadcast %19 : vector<1x64xf32> to vector<16x64xf32>
    %21 = arith.mulf %18, %20 : vector<16x64xf32>
    %c0_7 = arith.constant 0 : index
    %c0_8 = arith.constant 0 : index
    %22 = vector.load %arg3[%c0_7, %c0_8] : memref<1x64xf32, #tpu.memory_space<vmem>>, vector<1x64xf32>
    %23 = vector.broadcast %22 : vector<1x64xf32> to vector<16x64xf32>
    %24 = arith.addf %21, %23 : vector<16x64xf32>
    %c0_9 = arith.constant 0 : index
    %c0_10 = arith.constant 0 : index
    %25 = vector.load %arg4[%c0_9, %c0_10] : memref<16x64xf32, #tpu.memory_space<vmem>>, vector<16x64xf32>
    tpu.vector_store %arg4[%c0_9, %c0_10], %24 {strides = array<i32>} : memref<16x64xf32, #tpu.memory_space<vmem>>, vector<16x64xf32>,
    return
  }
  func.func @transform_0(%arg0: i32) -> (i32, i32) {
    %c0_i32 = arith.constant 0 : i32
    %c0_i32_0 = arith.constant 0 : i32
    %c0_i32_1 = arith.constant 0 : i32
    return %c0_i32, %c0_i32_0 : i32, i32
  }
  func.func @transform_1(%arg0: i32) -> (i32, i32) {
    %c0_i32 = arith.constant 0 : i32
    %c0_i32_0 = arith.constant 0 : i32
    %c0_i32_1 = arith.constant 0 : i32
    return %c0_i32, %c0_i32_0 : i32, i32
  }
  func.func @transform_2(%arg0: i32) -> (i32, i32) {
    %c0_i32 = arith.constant 0 : i32
    %c0_i32_0 = arith.constant 0 : i32
    %c0_i32_1 = arith.constant 0 : i32
    return %c0_i32, %c0_i32_0 : i32, i32
  }
  func.func @transform_3(%arg0: i32) -> (i32, i32) {
    %c0_i32 = arith.constant 0 : i32
    %c0_i32_0 = arith.constant 0 : i32
    %c0_i32_1 = arith.constant 0 : i32
    return %c0_i32, %c0_i32_0 : i32, i32
  }
}

</mosaic_0001>

<bundles_post_ra>
// kernel: tpu_custom_call.1
= control target key start
LH: loop header
LB: loop body
LE: loop exit
PB: predicated region body
PF: predicated region fallthrough
CT: control target
= control target key end

     0   :  { %8 = vsyncpa [#allocation3], 0  ;;  %s220_s0 = inlined_call_operand.hbm [shape: f32[16,64], index: 0, kind: input, shape index: {}]   ;;  %s221_s1 = inlined_call_operand.vmem [shape: f32[1,64], index: 1, kind: input, shape index: {}]   ;;  %s222_s2 = inlined_call_operand.vmem [shape: f32[1,64], index: 2, kind: input, shape index: {}]   ;;  %s223_s3 = inlined_call_operand.hbm [shape: f32[16,64], index: 3, kind: output, shape index: {}]  }
   0x1   :  { %9 = vsyncpa [#allocation4], 0  ;;  %s154_s12 = smov [#allocation2]   ;;  %s106_s16 = scalar_lea.hbm %s220_s0, 256 }
   0x2   :  { %s15_s13 = sshll.u32 %s154_s12, 4  ;;  %p107_p0 = scmp.ne.s32.totalorder %s220_s0, %s106_s16  ;;  %s16_s13 = int_to_ptr.vmem [resolvable:$true] %s15_s13 }
   0x3   :  { %p110_p1 = scmp.lt.u32.totalorder %s106_s16, %s220_s0 }
   0x5   :  { %p112_p2 = pnand %p110_p1, %p107_p0 }
   0x7   :  { %115 = shalt.err (!%p112_p2)
}
   0x8   :  { %s116_s21 = scalar_lea.vmem %s16_s13, 256  ;;  %p121_p4 = scmp.lt.s32.totalorder %s16_s13, %s16_s13 }
   0x9   :  { %p117_p3 = scmp.ne.s32.totalorder %s16_s13, %s116_s21  ;;  %p122_p5 = scmp.lt.s32.totalorder %s116_s21, %s116_s21 }
   0xb   :  { %p123_p6 = por %p122_p5, %p121_p4 }
   0xd   :  { %p124_p7 = pnand %p123_p6, %p117_p3 }
   0xf   :  { %127 = shalt.err (!%p124_p7)
}
  0x10   :  { %s155_s22 = smov 128   ;;  %s156_s23 = smov 8  }
  0x11   :  { %21 = dma.hbm_to_vmem [thread:$0]  %s220_s0, 256, %s16_s13, [#allocation3], %s155_s22, %s155_s22, %s156_s23  }
  0x12   :  { %150 = dma.done.wait [#allocation3], 256  }
  0x13   :  { %151 = vsyncadd [#allocation3], 4294967040  ;;  %vm31_vm0 = vcmask 523264   ;;  %v29_v0 = vld [vmem:[#allocation2] sm:$0xff]  ;;  %v30_v1 = vld [vmem:[#allocation2 + $0x8] sm:$0xff]  ;;  %s157_s29 = smov [#allocation5]  }
  0x14   :  { %v32_v2 = vsel %vm31_vm0, %v29_v0, 0.0  ;;  %v35_v3 = vsel %vm31_vm0, %v30_v1, 0.0  ;;  %v96_v21 = vld [vmem:[%s221_s1] ss:$0 sm:$0xff]  ;;  %s84_s30 = sshll.u32 %s157_s29, 4  ;;  %s85_s30 = int_to_ptr.vmem [resolvable:$true] %s84_s30 }
  0x15   :  { %33 = vadd.xlane.f32.xlu0 %v32_v2  ;;  %v97_v23 = vld [vmem:[%s222_s2] ss:$0 sm:$0xff]  ;;  %s128_s4 = scalar_lea.vmem %s85_s30, 256  ;;  %p133_p9 = scmp.lt.s32.totalorder %s85_s30, %s85_s30 }
  0x16   :  { %p129_p8 = scmp.ne.s32.totalorder %s85_s30, %s128_s4  ;;  %p134_p10 = scmp.lt.s32.totalorder %s128_s4, %s128_s4 }
  0x18   :  { %p135_p11 = por %p134_p10, %p133_p9 }
  0x19   :  { %36 = vadd.xlane.f32.xlu0 %v35_v3 }
  0x1a   :  { %p136_p12 = pnand %p135_p11, %p129_p8 }
  0xa2   :  { %v34_v4 = vpop.xlane.xlu0 %33 }
  0xa3   :  { %v39_v5 = vmul.f32 0.015625, %v34_v4 }
  0xa5   :  { %v41_v6 = vsub.f32 %v29_v0, %v39_v5 }
  0xa6   :  { %v37_v7 = vpop.xlane.xlu0 %36 }
  0xa7   :  { %v40_v8 = vmul.f32 0.015625, %v37_v7  ;;  %v43_v9 = vmul.f32 %v41_v6, %v41_v6 }
  0xa9   :  { %v42_v10 = vsub.f32 %v30_v1, %v40_v8  ;;  %v45_v11 = vsel %vm31_vm0, %v43_v9, 0.0 }
  0xaa   :  { %46 = vadd.xlane.f32.xlu1 %v45_v11 }
  0xab   :  { %v44_v12 = vmul.f32 %v42_v10, %v42_v10 }
  0xad   :  { %v48_v13 = vsel %vm31_vm0, %v44_v12, 0.0 }
  0xae   :  { %49 = vadd.xlane.f32.xlu1 %v48_v13 }
 0x137   :  { %v47_v14 = vpop.xlane.xlu1 %46 }
 0x138   :  { %v51_v15 = vmul.f32 0.015625, %v47_v14 }
 0x13a   :  { %v53_v16 = vadd.f32 1e-12, %v51_v15 }
 0x13b   :  { %v50_v17 = vpop.xlane.xlu1 %49 }
 0x13c   :  { %102 = vrsqrt.f32 %v53_v16  ;;  %v52_v18 = vmul.f32 0.015625, %v50_v17 }
 0x13e   :  { %v54_v19 = vadd.f32 1e-12, %v52_v18 }
 0x140   :  { %104 = vrsqrt.f32 %v54_v19 }
 0x146   :  { %v103_v20 = vpop.eup %102 }
 0x147   :  { %v57_v22 = vmul.f32 %v103_v20, %v41_v6 }
 0x149   :  { %v66_v24 = vmul.f32 %v96_v21, %v57_v22 }
 0x14a   :  { %v105_v25 = vpop.eup %104 }
 0x14b   :  { %v58_v26 = vmul.f32 %v105_v25, %v42_v10  ;;  %v75_v27 = vadd.f32 %v97_v23, %v66_v24 }
 0x14d   :  { %v67_v28 = vmul.f32 %v96_v21, %v58_v26  ;;  %77 = vst.msk [vmem:[#allocation5] sm:$0xff] %vm31_vm0, %v75_v27 }
 0x14f   :  { %v76_v29 = vadd.f32 %v97_v23, %v67_v28 }
 0x151   :  { %78 = vst.msk [vmem:[#allocation5 + $0x8] sm:$0xff] %vm31_vm0, %v76_v29 }
 0x152   :  { %139 = shalt.err (!%p136_p12)
}
 0x153   :  { %s140_s5 = scalar_lea.hbm %s223_s3, 256 }
 0x154   :  { %p141_p13 = scmp.ne.s32.totalorder %s223_s3, %s140_s5  ;;  %p144_p0 = scmp.lt.u32.totalorder %s140_s5, %s223_s3 }
 0x156   :  { %p146_p1 = pnand %p144_p0, %p141_p13 }
 0x158   :  { %149 = shalt.err (!%p146_p1)
}
 0x159   :  { %90 = dma.vmem_to_hbm [thread:$0]  %s85_s30, 256, %s223_s3, [#allocation4], %s155_s22, %s155_s22, %s156_s23  }
 0x15a   :  { %152 = dma.done.wait [#allocation4], 256  }
 0x15b   :  { %153 = vsyncadd [#allocation4], 4294967040 }
 0x15c   :  { %94 = vsyncpa [#allocation3], 1 }
 0x15d   :  { %95 = vsyncpa [#allocation4], 1 }

</bundles_post_ra>
